<compile_context>
chip_gen: v6e
topology: v6e:2x2x1
jax: 0.10.0
libtpu: 0.0.40
codegen_flags: <defaults>
</compile_context>

<pallas_src>
import jax
import jax.numpy as jnp
import numpy as np
from jax.experimental import pallas as pl
from jax.experimental.pallas import tpu as pltpu


def _elu(x):
    # torch.nn.ELU (alpha=1.0); clamp the exp argument so the discarded
    # branch never produces inf.
    return jnp.where(x > 0, x, jnp.exp(jnp.minimum(x, 0.0)) - 1.0)


def make_graph_predictor_kernel(dense_depth: int, H: int, S: int,
                                Gt: int, B: int):
    """Kernel for one grid step processing Gt flattened graph-batches.

    Ref layout per grid step:
      gid_ref    : (1, 1, Gt*N) int32  global graph id per node (id + j*B)
      x_ref      : (1, Gt*N, H) f32    node features (flattened over Gt)
      static_ref : (1, Gt*B, S) f32    per-graph covariates (flattened)
      w_slab_ref : (H+S [+F], F_or_out) f32   [W1a ; W1b (; Wout_pad)]
      [w_hid_ref : (depth-1, F, F) f32]       only if dense_depth >= 2
      bias_ref   : (depth+1, F_or_out) f32    [b1 ; b_hidden... (; bout_pad)]
      out_ref    : (1, Gt*B, F_or_out) f32
    """
    F = H + S
    GB = Gt * B

    def kernel(*refs):
        gid_ref, x_ref, static_ref, w_slab_ref = refs[:4]
        out_ref = refs[-1]
        if dense_depth >= 2:
            w_hid_ref, bias_ref = refs[4], refs[5]
        else:
            w_hid_ref, bias_ref = None, refs[4]

        x = x_ref[0]                           # (Gt*N, H)
        static = static_ref[0]                 # (Gt*B, S)
        gids = gid_ref[0]                      # (1, Gt*N) int32
        GN = x.shape[0]

        # --- global_mean_pool over all Gt graph-batches at once -------------
        # Block-diagonal one-hot built directly as (Gt*B, Gt*N): no transpose,
        # long axis (nodes) on lanes.
        row = jax.lax.broadcasted_iota(jnp.int32, (GB, GN), 0)
        onehot = (row == gids).astype(jnp.float32)                     # (GB, GN)

        sums = jnp.dot(onehot, x, preferred_element_type=jnp.float32)  # MXU
        counts = jnp.sum(onehot, axis=-1, keepdims=True)               # XLU reduce
        counts = jnp.maximum(counts, 1.0)
        pooled = sums / counts                                         # (GB, H)

        # --- dense stack (first layer split: replaces lane-axis concat) -----
        w_slab = w_slab_ref[...]
        biases = bias_ref[...]
        w1a = w_slab[:H]                       # (H, F_or_out)
        w1b = w_slab[H:H + S]                  # (S, F_or_out)
        h = (jnp.dot(pooled, w1a, preferred_element_type=jnp.float32)
             + jnp.dot(static, w1b, preferred_element_type=jnp.float32)
             + biases[0:1, :])

        if dense_depth > 0:
            h = _elu(h)
            # remaining dense ELU layers (latent_dropout = identity at eval)
            for d in range(dense_depth - 1):
                w = w_hid_ref[d]                                   # (F, F)
                b = biases[d + 1:d + 2, :]
                h = _elu(jnp.dot(h, w, preferred_element_type=jnp.float32) + b)
            # output projection (columns zero-padded to F; sliced outside)
            w_out = w_slab[H + S:H + S + F]                        # (F, F)
            h = (jnp.dot(h, w_out, preferred_element_type=jnp.float32)
                 + biases[dense_depth:dense_depth + 1, :])

        out_ref[0] = h.astype(out_ref.dtype)

    return kernel


def _resident_spec(arr):
    """Constant index_map -> operand stays resident across the grid."""
    nd = arr.ndim
    return pl.BlockSpec(arr.shape, lambda s, _nd=nd: (0,) * _nd)


def _auto_num_steps(G: int) -> int:
    """1 step on v5e/v6e (single TC); 2 parallel steps on v7x (2 TCs)."""
    try:
        kind = jax.devices()[0].device_kind.lower()
    except Exception:
        return 1
    if any(tag in kind for tag in ("v7", "tpu7", "7x")) and G % 2 == 0:
        return 2
    return 1


def graph_predictor_forward(batch_idx, x, static_feats, dense_params,
                            w_out, b_out, num_steps=None):
    """Batched forward over G independent graph-batches.

    batch_idx    : (G, N)   int32 graph id per node (ids in [0, B))
    x            : (G, N, H) node features
    static_feats : (G, B, S) per-graph covariates
    returns      : (G, B, out_dim)
    """
    G, N, H = x.shape
    _, B, S = static_feats.shape
    F = H + S
    out_dim = w_out.shape[1]
    dense_depth = len(dense_params)

    if num_steps is None:
        num_steps = _auto_num_steps(G)
    if G % num_steps != 0:
        num_steps = 1
    Gt = G // num_steps

    # --- pack parameters into few resident operands -------------------------
    # First layer consuming [pooled ; static] is split so the kernel never
    # concatenates along lanes: cat @ W == pooled @ W[:H] + static @ W[H:].
    if dense_depth > 0:
        w1, b1 = dense_params[0]
        w_out_pad = jnp.zeros((F, F), jnp.float32).at[:, :out_dim].set(w_out)
        b_out_pad = jnp.zeros((F,), jnp.float32).at[:out_dim].set(b_out)
        w_slab = jnp.concatenate([w1[:H, :], w1[H:, :], w_out_pad], axis=0)
        biases = jnp.stack(
            [b1] + [b for (_, b) in dense_params[1:]] + [b_out_pad], axis=0)
        hidden_ws = [w for (w, _) in dense_params[1:]]
        params = [w_slab]
        if hidden_ws:
            params.append(jnp.stack(hidden_ws, axis=0))
        params.append(biases)
        out_cols = F
    else:
        # The split layer IS the output layer.
        w_slab = jnp.concatenate([w_out[:H, :], w_out[H:, :]], axis=0)
        biases = b_out.reshape(1, out_dim)
        params = [w_slab, biases]
        out_cols = out_dim

    # --- flatten graph-batches; precompute per-step global graph ids --------
    local_off = (jnp.arange(G, dtype=jnp.int32) % Gt)[:, None] * B   # (G, 1)
    gids = (batch_idx.astype(jnp.int32) + local_off).reshape(num_steps, 1, Gt * N)
    x_flat = x.reshape(num_steps, Gt * N, H)
    static_flat = static_feats.reshape(num_steps, Gt * B, S)

    kernel = make_graph_predictor_kernel(dense_depth, H, S, Gt, B)

    in_specs = [
        pl.BlockSpec((1, 1, Gt * N), lambda s: (s, 0, 0)),      # graph ids
        pl.BlockSpec((1, Gt * N, H), lambda s: (s, 0, 0)),      # node features
        pl.BlockSpec((1, Gt * B, S), lambda s: (s, 0, 0)),      # covariates
    ] + [_resident_spec(p) for p in params]

    # Shapes are tiny (<< scoped VMEM on v5e/v6e and well under v7x's
    # 64 MiB physical / 32 MiB scoped default, even double-buffered); no
    # vmem_limit override needed.  If N/H/G scale, re-tile the node axis with
    # an "arbitrary" reduction grid + VMEM accumulators, sizing for v7x's
    # smaller VMEM and setting vmem_limit_bytes explicitly.
    out = pl.pallas_call(
        kernel,
        out_shape=jax.ShapeDtypeStruct((num_steps, Gt * B, out_cols),
                                       jnp.float32),
        grid=(num_steps,),
        in_specs=in_specs,
        out_specs=pl.BlockSpec((1, Gt * B, out_cols), lambda s: (s, 0, 0)),
        compiler_params=pltpu.CompilerParams(
            dimension_semantics=("parallel",)),
    )(gids, x_flat, static_flat, *params)

    out = out.reshape(G, B, out_cols)
    return out[:, :, :out_dim]


def reference_forward(batch_idx, x, static_feats, dense_params, w_out, b_out):
    """Pure-JAX reference of the PyTorch forward (eval mode), one graph-batch."""
    B = static_feats.shape[0]
    onehot = jax.nn.one_hot(batch_idx, B, dtype=jnp.float32)     # (N, B)
    sums = onehot.T @ x
    counts = jnp.maximum(onehot.sum(axis=0, keepdims=True).T, 1.0)
    pooled = sums / counts
    h = jnp.concatenate([pooled, static_feats], axis=-1)
    for (w, b) in dense_params:
        h = jax.nn.elu(h @ w + b)
    return h @ w_out + b_out


if __name__ == "__main__":
    # Small shapes consistent with the module: G independent graph-batches,
    # each with N nodes grouped into B graphs, hidden_features=32,
    # static_features=16, dense_depth=2, out_dimension=4.
    G = 4
    N, B = 64, 8
    hidden_features, static_features = 32, 16
    out_dimension, dense_depth = 4, 2
    num_features = hidden_features + static_features

    key = jax.random.PRNGKey(0)
    k_x, k_s, k_b, *k_w = jax.random.split(key, 3 + 2 * (dense_depth + 1))

    x = jax.random.normal(k_x, (G, N, hidden_features), dtype=jnp.float32)
    static_feats = jax.random.normal(k_s, (G, B, static_features),
                                     dtype=jnp.float32)
    # Sorted graph ids so every graph gets some nodes (like PyG batching).
    batch_idx = jnp.sort(
        jax.random.randint(k_b, (G, N), 0, B, dtype=jnp.int32), axis=-1)

    # Deterministic parameter init (shapes from __init__; weights stored as
    # (in, out), equivalent to PyTorch's x @ W.T + b with W:(out, in)).
    dense_params = []
    for d in range(dense_depth):
        w = jax.random.normal(k_w[2 * d], (num_features, num_features),
                              dtype=jnp.float32) * 0.1
        b = jax.random.normal(k_w[2 * d + 1], (num_features,),
                              dtype=jnp.float32) * 0.1
        dense_params.append((w, b))
    w_out = jax.random.normal(k_w[2 * dense_depth],
                              (num_features, out_dimension),
                              dtype=jnp.float32) * 0.1
    b_out = jax.random.normal(k_w[2 * dense_depth + 1], (out_dimension,),
                              dtype=jnp.float32) * 0.1

    # TODO(synk): input_dropout / latent_dropout are identity in eval mode; omitted.
    logits = graph_predictor_forward(batch_idx, x, static_feats, dense_params,
                                     w_out, b_out)
    logits = jax.block_until_ready(logits)

    ref = jax.vmap(
        lambda bi, xx, st: reference_forward(bi, xx, st, dense_params,
                                             w_out, b_out)
    )(batch_idx, x, static_feats)

    np.testing.assert_allclose(np.asarray(logits), np.asarray(ref),
                               rtol=1e-5, atol=1e-5)
    print("KERNEL_OK")
</pallas_src>

<mosaic_0001>
module attributes {stable_mosaic.version = 11 : i64} {
  func.func @kernel(%arg0: i32, %arg1: memref<1x1x256xi32, #tpu.memory_space<vmem>>, %arg2: memref<1x256x32xf32, #tpu.memory_space<vmem>>, %arg3: memref<1x32x16xf32, #tpu.memory_space<vmem>>, %arg4: memref<96x48xf32, #tpu.memory_space<vmem>>, %arg5: memref<1x48x48xf32, #tpu.memory_space<vmem>>, %arg6: memref<3x48xf32, #tpu.memory_space<vmem>>, %arg7: memref<1x32x48xf32, #tpu.memory_space<vmem>>) attributes {dimension_semantics = [#tpu.dimension_semantics<parallel>], iteration_bounds = array<i64: 1>, scalar_prefetch = 0 : i64, scratch_operands = 0 : i64, tpu.core_type = #tpu.core_type<tc>, window_params = [{transform_indices = @transform_0, window_bounds = array<i64: 1, 1, 256>}, {transform_indices = @transform_1, window_bounds = array<i64: 1, 256, 32>}, {transform_indices = @transform_2, window_bounds = array<i64: 1, 32, 16>}, {pipeline_mode = #tpu.pipeline_mode<synchronous>, transform_indices = @transform_3, window_bounds = array<i64: 96, 48>}, {pipeline_mode = #tpu.pipeline_mode<synchronous>, transform_indices = @transform_4, window_bounds = array<i64: 1, 48, 48>}, {pipeline_mode = #tpu.pipeline_mode<synchronous>, transform_indices = @transform_5, window_bounds = array<i64: 3, 48>}, {transform_indices = @transform_6, window_bounds = array<i64: 1, 32, 48>}]} {
    %c0 = arith.constant 0 : index
    %c0_0 = arith.constant 0 : index
    %c0_1 = arith.constant 0 : index
    %0 = vector.load %arg2[%c0, %c0_0, %c0_1] : memref<1x256x32xf32, #tpu.memory_space<vmem>>, vector<1x256x32xf32>
    %1 = vector.shape_cast %0 : vector<1x256x32xf32> to vector<256x32xf32>
    %c0_2 = arith.constant 0 : index
    %c0_3 = arith.constant 0 : index
    %c0_4 = arith.constant 0 : index
    %2 = vector.load %arg3[%c0_2, %c0_3, %c0_4] : memref<1x32x16xf32, #tpu.memory_space<vmem>>, vector<1x32x16xf32>
    %3 = vector.shape_cast %2 : vector<1x32x16xf32> to vector<32x16xf32>
    %c0_5 = arith.constant 0 : index
    %c0_6 = arith.constant 0 : index
    %c0_7 = arith.constant 0 : index
    %4 = vector.load %arg1[%c0_5, %c0_6, %c0_7] : memref<1x1x256xi32, #tpu.memory_space<vmem>>, vector<1x1x256xi32>
    %5 = vector.shape_cast %4 : vector<1x1x256xi32> to vector<1x256xi32>
    %6 = tpu.iota {dimensions = array<i32: 0>} : vector<32x256xi32>
    %7 = vector.broadcast %5 : vector<1x256xi32> to vector<32x256xi32>
    %8 = arith.cmpi eq, %6, %7 : vector<32x256xi32>
    %9 = arith.extui %8 : vector<32x256xi1> to vector<32x256xi32>
    %10 = arith.sitofp %9 : vector<32x256xi32> to vector<32x256xf32>
    %cst = arith.constant dense<0.000000e+00> : vector<32x32xf32>
    %11 = tpu.matmul %10, %1, %cst {dimension_numbers = #tpu.dot_dimension_numbers<[1], [0], [0], [1], [0, 0, 1, 1], [], []>} : vector<32x256xf32>, vector<256x32xf32>, vector<32x32xf32> -> vector<32x32xf32>
    %cst_8 = arith.constant dense<0.000000e+00> : vector<32xf32>
    %12 = vector.multi_reduction <add>, %10, %cst_8 [1] : vector<32x256xf32> to vector<32xf32>
    %13 = vector.shape_cast %12 : vector<32xf32> to vector<32x1xf32>
    %cst_9 = arith.constant 1.000000e+00 : f32
    %14 = vector.broadcast %cst_9 : f32 to vector<32x1xf32>
    %15 = arith.maximumf %13, %14 : vector<32x1xf32>
    %16 = vector.broadcast %15 : vector<32x1xf32> to vector<32x32xf32>
    %17 = arith.divf %11, %16 : vector<32x32xf32>
    %c0_10 = arith.constant 0 : index
    %c0_11 = arith.constant 0 : index
    %18 = vector.load %arg4[%c0_10, %c0_11] : memref<96x48xf32, #tpu.memory_space<vmem>>, vector<96x48xf32>
    %c0_12 = arith.constant 0 : index
    %c0_13 = arith.constant 0 : index
    %19 = vector.load %arg6[%c0_12, %c0_13] : memref<3x48xf32, #tpu.memory_space<vmem>>, vector<3x48xf32>
    %20 = vector.extract_strided_slice %18 {offsets = [0, 0], sizes = [32, 48], strides = [1, 1]} : vector<96x48xf32> to vector<32x48xf32>
    %21 = vector.extract_strided_slice %18 {offsets = [32, 0], sizes = [16, 48], strides = [1, 1]} : vector<96x48xf32> to vector<16x48xf32>
    %cst_14 = arith.constant dense<0.000000e+00> : vector<32x48xf32>
    %22 = tpu.matmul %17, %20, %cst_14 {dimension_numbers = #tpu.dot_dimension_numbers<[1], [0], [0], [1], [0, 0, 1, 1], [], []>} : vector<32x32xf32>, vector<32x48xf32>, vector<32x48xf32> -> vector<32x48xf32>
    %cst_15 = arith.constant dense<0.000000e+00> : vector<32x48xf32>
    %23 = tpu.matmul %3, %21, %cst_15 {dimension_numbers = #tpu.dot_dimension_numbers<[1], [0], [0], [1], [0, 0, 1, 1], [], []>} : vector<32x16xf32>, vector<16x48xf32>, vector<32x48xf32> -> vector<32x48xf32>
    %24 = arith.addf %22, %23 : vector<32x48xf32>
    %25 = vector.extract_strided_slice %19 {offsets = [0, 0], sizes = [1, 48], strides = [1, 1]} : vector<3x48xf32> to vector<1x48xf32>
    %26 = vector.broadcast %25 : vector<1x48xf32> to vector<32x48xf32>
    %27 = arith.addf %24, %26 : vector<32x48xf32>
    %cst_16 = arith.constant 0.000000e+00 : f32
    %28 = vector.broadcast %cst_16 : f32 to vector<32x48xf32>
    %29 = arith.cmpf ogt, %27, %28 : vector<32x48xf32>
    %cst_17 = arith.constant 0.000000e+00 : f32
    %30 = vector.broadcast %cst_17 : f32 to vector<32x48xf32>
    %31 = arith.minimumf %27, %30 : vector<32x48xf32>
    %32 = math.exp %31 : vector<32x48xf32>
    %cst_18 = arith.constant 1.000000e+00 : f32
    %33 = vector.broadcast %cst_18 : f32 to vector<32x48xf32>
    %34 = arith.subf %32, %33 : vector<32x48xf32>
    %35 = arith.select %29, %27, %34 : vector<32x48xi1>, vector<32x48xf32>
    %c0_19 = arith.constant 0 : index
    %c0_20 = arith.constant 0 : index
    %c0_21 = arith.constant 0 : index
    %36 = vector.load %arg5[%c0_19, %c0_20, %c0_21] : memref<1x48x48xf32, #tpu.memory_space<vmem>>, vector<1x48x48xf32>
    %37 = vector.shape_cast %36 : vector<1x48x48xf32> to vector<48x48xf32>
    %38 = vector.extract_strided_slice %19 {offsets = [1, 0], sizes = [1, 48], strides = [1, 1]} : vector<3x48xf32> to vector<1x48xf32>
    %cst_22 = arith.constant dense<0.000000e+00> : vector<32x48xf32>
    %39 = tpu.matmul %35, %37, %cst_22 {dimension_numbers = #tpu.dot_dimension_numbers<[1], [0], [0], [1], [0, 0, 1, 1], [], []>} : vector<32x48xf32>, vector<48x48xf32>, vector<32x48xf32> -> vector<32x48xf32>
    %40 = vector.broadcast %38 : vector<1x48xf32> to vector<32x48xf32>
    %41 = arith.addf %39, %40 : vector<32x48xf32>
    %cst_23 = arith.constant 0.000000e+00 : f32
    %42 = vector.broadcast %cst_23 : f32 to vector<32x48xf32>
    %43 = arith.cmpf ogt, %41, %42 : vector<32x48xf32>
    %cst_24 = arith.constant 0.000000e+00 : f32
    %44 = vector.broadcast %cst_24 : f32 to vector<32x48xf32>
    %45 = arith.minimumf %41, %44 : vector<32x48xf32>
    %46 = math.exp %45 : vector<32x48xf32>
    %cst_25 = arith.constant 1.000000e+00 : f32
    %47 = vector.broadcast %cst_25 : f32 to vector<32x48xf32>
    %48 = arith.subf %46, %47 : vector<32x48xf32>
    %49 = arith.select %43, %41, %48 : vector<32x48xi1>, vector<32x48xf32>
    %50 = vector.extract_strided_slice %18 {offsets = [48, 0], sizes = [48, 48], strides = [1, 1]} : vector<96x48xf32> to vector<48x48xf32>
    %cst_26 = arith.constant dense<0.000000e+00> : vector<32x48xf32>
    %51 = tpu.matmul %49, %50, %cst_26 {dimension_numbers = #tpu.dot_dimension_numbers<[1], [0], [0], [1], [0, 0, 1, 1], [], []>} : vector<32x48xf32>, vector<48x48xf32>, vector<32x48xf32> -> vector<32x48xf32>
    %52 = vector.extract_strided_slice %19 {offsets = [2, 0], sizes = [1, 48], strides = [1, 1]} : vector<3x48xf32> to vector<1x48xf32>
    %53 = vector.broadcast %52 : vector<1x48xf32> to vector<32x48xf32>
    %54 = arith.addf %51, %53 : vector<32x48xf32>
    %c0_27 = arith.constant 0 : index
    %c0_28 = arith.constant 0 : index
    %c0_29 = arith.constant 0 : index
    %55 = vector.load %arg7[%c0_27, %c0_28, %c0_29] : memref<1x32x48xf32, #tpu.memory_space<vmem>>, vector<1x32x48xf32>
    %56 = vector.shape_cast %55 : vector<1x32x48xf32> to vector<32x48xf32>
    %57 = vector.shape_cast %54 : vector<32x48xf32> to vector<1x32x48xf32>
    tpu.vector_store %arg7[%c0_27, %c0_28, %c0_29], %57 {strides = array<i32>} : memref<1x32x48xf32, #tpu.memory_space<vmem>>, vector<1x32x48xf32>,
    return
  }
  func.func @transform_0(%arg0: i32) -> (i32, i32, i32) {
    %c0_i32 = arith.constant 0 : i32
    %c0_i32_0 = arith.constant 0 : i32
    %c0_i32_1 = arith.constant 0 : i32
    return %arg0, %c0_i32, %c0_i32_0 : i32, i32, i32
  }
  func.func @transform_1(%arg0: i32) -> (i32, i32, i32) {
    %c0_i32 = arith.constant 0 : i32
    %c0_i32_0 = arith.constant 0 : i32
    %c0_i32_1 = arith.constant 0 : i32
    return %arg0, %c0_i32, %c0_i32_0 : i32, i32, i32
  }
  func.func @transform_2(%arg0: i32) -> (i32, i32, i32) {
    %c0_i32 = arith.constant 0 : i32
    %c0_i32_0 = arith.constant 0 : i32
    %c0_i32_1 = arith.constant 0 : i32
    return %arg0, %c0_i32, %c0_i32_0 : i32, i32, i32
  }
  func.func @transform_3(%arg0: i32) -> (i32, i32) {
    %c0_i32 = arith.constant 0 : i32
    %c0_i32_0 = arith.constant 0 : i32
    %c0_i32_1 = arith.constant 0 : i32
    return %c0_i32, %c0_i32_0 : i32, i32
  }
  func.func @transform_4(%arg0: i32) -> (i32, i32, i32) {
    %c0_i32 = arith.constant 0 : i32
    %c0_i32_0 = arith.constant 0 : i32
    %c0_i32_1 = arith.constant 0 : i32
    %c0_i32_2 = arith.constant 0 : i32
    return %c0_i32, %c0_i32_0, %c0_i32_1 : i32, i32, i32
  }
  func.func @transform_5(%arg0: i32) -> (i32, i32) {
    %c0_i32 = arith.constant 0 : i32
    %c0_i32_0 = arith.constant 0 : i32
    %c0_i32_1 = arith.constant 0 : i32
    return %c0_i32, %c0_i32_0 : i32, i32
  }
  func.func @transform_6(%arg0: i32) -> (i32, i32, i32) {
    %c0_i32 = arith.constant 0 : i32
    %c0_i32_0 = arith.constant 0 : i32
    %c0_i32_1 = arith.constant 0 : i32
    return %arg0, %c0_i32, %c0_i32_0 : i32, i32, i32
  }
}

</mosaic_0001>

<bundles_post_ra>
// kernel: tpu_custom_call.1
= control target key start
LH: loop header
LB: loop body
LE: loop exit
PB: predicated region body
PF: predicated region fallthrough
CT: control target
= control target key end

     0   :  { %v61_v3 = vlaneseq  ;;  %s1254_s0 = inlined_call_operand.vmem [shape: s32[1,1,256], index: 0, kind: input, shape index: {}]   ;;  %s1255_s1 = inlined_call_operand.vmem [shape: f32[1,256,32], index: 1, kind: input, shape index: {}]   ;;  %s1256_s2 = inlined_call_operand.vmem [shape: f32[1,32,16], index: 2, kind: input, shape index: {}]   ;;  %s1257_s3 = inlined_call_operand.vmem [shape: f32[96,48], index: 3, kind: input, shape index: {}]   ;;  %s1258_s4 = inlined_call_operand.vmem [shape: f32[1,48,48], index: 4, kind: input, shape index: {}]   ;;  %s1259_s5 = inlined_call_operand.vmem [shape: f32[3,48], index: 5, kind: input, shape index: {}]   ;;  %s1260_s6 = inlined_call_operand.hbm [shape: f32[1,32,48], index: 6, kind: output, shape index: {}]  }
   0x1   :  { %v55_v0 = vld [vmem:[%s1255_s1 + $0xf8] sm:$0xff]  ;;  %v54_v2 = vld [vmem:[%s1255_s1 + $0xf0] sm:$0xff]  ;;  %v53_v5 = vld [vmem:[%s1255_s1 + $0xe8] sm:$0xff] }
   0x2   :  { %v39_v1 = vld [vmem:[%s1255_s1 + $0x78] sm:$0xff]  ;;  %741 = vmatprep.subr.mxu0 %v55_v0  ;;  %v38_v4 = vld [vmem:[%s1255_s1 + $0x70] sm:$0xff]  ;;  %v37_v6 = vld [vmem:[%s1255_s1 + $0x68] sm:$0xff]  ;;  %v988_v7 = vshrl.u32 %v61_v3, 7 }
   0x3   :  { %742 = vmatpush3.msra.mxu0 %v39_v1  ;;  %v52_v8 = vld [vmem:[%s1255_s1 + $0xe0] sm:$0xff]  ;;  %v51_v10 = vld [vmem:[%s1255_s1 + $0xd8] sm:$0xff]  ;;  %v50_v14 = vld [vmem:[%s1255_s1 + $0xd0] sm:$0xff] }
   0x4   :  { %743 = vmatprep.subr.mxu0 %v54_v2  ;;  %v36_v9 = vld [vmem:[%s1255_s1 + $0x60] sm:$0xff]  ;;  %v35_v11 = vld [vmem:[%s1255_s1 + $0x58] sm:$0xff]  ;;  %v68_v12 = vsub.s32 0, %v988_v7  ;;  %v72_v13 = vsub.s32 1, %v988_v7  ;;  %v34_v15 = vld [vmem:[%s1255_s1 + $0x50] sm:$0xff]  ;;  %v1011_v16 = vadd.s32 8, %v988_v7 }
   0x5   :  { %744 = vmatpush3.msra.mxu0 %v38_v4  ;;  %v49_v17 = vld [vmem:[%s1255_s1 + $0xc8] sm:$0xff]  ;;  %v60_v18 = vld [vmem:[%s1254_s0] sm:$0x3]  ;;  %v1020_v19 = vadd.s32 16, %v988_v7  ;;  %v1034_v23 = vadd.s32 24, %v988_v7 }
   0x6   :  { %745 = vmatprep.subr.mxu0 %v53_v5  ;;  %v33_v20 = vld [vmem:[%s1255_s1 + $0x48] sm:$0xff]  ;;  %v1027_v21 = vrot.slane %v60_v18, %v68_v12  ;;  %v1031_v22 = vrot.slane %v60_v18, %v72_v13 }
   0x7   :  { %746 = vmatpush3.msra.mxu0 %v37_v6 }
   0x8   :  { %747 = vmatprep.subr.mxu0 %v52_v8 }
   0x9   :  { %748 = vmatpush3.msra.mxu0 %v36_v9 }
   0xa   :  { %749 = vmatprep.subr.mxu0 %v51_v10 }
   0xb   :  { %750 = vmatpush3.msra.mxu0 %v35_v11 }
   0xc   :  { %751 = vmatprep.subr.mxu0 %v50_v14 }
   0xd   :  { %11 = vsyncpa [#allocation3], 0  ;;  %752 = vmatpush3.msra.mxu0 %v34_v15  ;;  %v48_v24 = vld [vmem:[%s1255_s1 + $0xc0] sm:$0xff]  ;;  %vm75_vm0 = vcmp.eq.s32.totalorder %v988_v7, %v1031_v22  ;;  %vm74_vm1 = vcmp.eq.s32.totalorder %v988_v7, %v1027_v21  ;;  %vm77_vm2 = vcmp.eq.s32.totalorder %v1011_v16, %v1031_v22  ;;  %v47_v26 = vld [vmem:[%s1255_s1 + $0xb8] sm:$0xff]  ;;  %v930_v27 = vmov 1.0  }
   0xe   :  { %753 = vmatprep.subr.mxu0 %v49_v17  ;;  %v32_v25 = vld [vmem:[%s1255_s1 + $0x40] sm:$0xff]  ;;  %709 = vmatprep.mubr.msk.f32.mxu0 %vm75_vm0, %v930_v27  ;;  %vm76_vm3 = vcmp.eq.s32.totalorder %v1011_v16, %v1027_v21  ;;  %vm79_vm4 = vcmp.eq.s32.totalorder %v1020_v19, %v1031_v22  ;;  %vm78_vm5 = vcmp.eq.s32.totalorder %v1020_v19, %v1027_v21  ;;  %v931_v28 = vmov 0.0   ;;  %v31_v30 = vld [vmem:[%s1255_s1 + $0x38] sm:$0xff]  ;;  %v46_v34 = vld [vmem:[%s1255_s1 + $0xb0] sm:$0xff] }
   0xf   :  { %754 = vmatpush3.msra.mxu0 %v33_v20  ;;  %v701_v29 = vsel %vm74_vm1, 1.0, %v931_v28  ;;  %vm81_vm6 = vcmp.eq.s32.totalorder %v1034_v23, %v1031_v22  ;;  %v702_v31 = vsel %vm75_vm0, 1.0, %v931_v28  ;;  %v703_v32 = vsel %vm76_vm3, 1.0, %v931_v28  ;;  %v30_v38 = vld [vmem:[%s1255_s1 + $0x30] sm:$0xff]  ;;  %v45_v42 = vld [vmem:[%s1255_s1 + $0xa8] sm:$0xff]  ;;  %v44_v46 = vld [vmem:[%s1255_s1 + $0xa0] sm:$0xff] }
  0x10   :  { %755 = vmatprep.subr.mxu0 %v48_v24  ;;  %v704_v33 = vsel %vm77_vm2, 1.0, %v931_v28  ;;  %vm80_vm7 = vcmp.eq.s32.totalorder %v1034_v23, %v1027_v21  ;;  %v183_v35 = vadd.f32 %v702_v31, %v701_v29  ;;  %v705_v36 = vsel %vm78_vm5, 1.0, %v931_v28  ;;  %v29_v44 = vld [vmem:[%s1255_s1 + $0x28] sm:$0xff]  ;;  %v28_v47 = vld [vmem:[%s1255_s1 + $0x20] sm:$0xff]  ;;  %v43_v48 = vld [vmem:[%s1255_s1 + $0x98] sm:$0xff] }
  0x11   :  { %756 = vmatpush3.msra.mxu0 %v32_v25  ;;  %v706_v37 = vsel %vm79_vm4, 1.0, %v931_v28  ;;  %v707_v40 = vsel %vm80_vm7, 1.0, %v931_v28  ;;  %v708_v41 = vsel %vm81_vm6, 1.0, %v931_v28  ;;  %v186_v43 = vadd.f32 %v704_v33, %v703_v32  ;;  %v27_v49 = vld [vmem:[%s1255_s1 + $0x18] sm:$0xff]  ;;  %v42_v50 = vld [vmem:[%s1255_s1 + $0x90] sm:$0xff]  ;;  %v41_v52 = vld [vmem:[%s1255_s1 + $0x88] sm:$0xff] }
  0x12   :  { %757 = vmatprep.subr.mxu0 %v47_v26  ;;  %v189_v39 = vadd.f32 %v706_v37, %v705_v36  ;;  %184 = vadd.xlane.f32.xlu0 %v183_v35  ;;  %v192_v45 = vadd.f32 %v708_v41, %v707_v40  ;;  %v26_v51 = vld [vmem:[%s1255_s1 + $0x10] sm:$0xff]  ;;  %v25_v53 = vld [vmem:[%s1255_s1 + $0x8] sm:$0xff]  ;;  %v40_v54 = vld [vmem:[%s1255_s1 + $0x80] sm:$0xff]  ;;  %vm220_vm8 = vcmask 130048   ;;  %vm318_vm9 = vcmask 261120  }
  0x13   :  { %758 = vmatpush3.msra.mxu0 %v31_v30  ;;  %v24_v55 = vld [vmem:[%s1255_s1] sm:$0xff]  ;;  %v212_v56 = vld [vmem:[%s1257_s3 + $0x28] sm:$0xff]  ;;  %v210_v60 = vld [vmem:[%s1257_s3 + $0x18] sm:$0xff]  ;;  %vm458_vm10 = vcmask 392192  }
  0x14   :  { %759 = vmatprep.subr.mxu0 %v46_v34  ;;  %190 = vadd.xlane.f32.xlu1 %v189_v39  ;;  %v211_v57 = vld [vmem:[%s1257_s3 + $0x20] sm:$0xff]  ;;  %v57_v59 = vld [vmem:[%s1256_s2 + $0x8] sm:$0xff]  ;;  %v58_v61 = vld [vmem:[%s1256_s2 + $0x10] sm:$0xff] }
  0x15   :  { %760 = vmatpush3.msra.mxu0 %v30_v38  ;;  %819 = vmatprep.subr.mxu1 %v212_v56  ;;  %v56_v58 = vld [vmem:[%s1256_s2] sm:$0xff]  ;;  %v209_v62 = vld [vmem:[%s1257_s3 + $0x10] sm:$0xff]  ;;  %v59_v63 = vld [vmem:[%s1256_s2 + $0x18] sm:$0xff] }
  0x16   :  { %761 = vmatprep.subr.mxu0 %v45_v42  ;;  %187 = vadd.xlane.f32.xlu0 %v186_v43  ;;  %v208_v0 = vld [vmem:[%s1257_s3 + $0x8] sm:$0xff]  ;;  %v207_v1 = vld [vmem:[%s1257_s3] sm:$0xff]  ;;  %v451_v35 = vld [vmem:[%s1258_s4 + $0x18] sm:$0xff] }
  0x17   :  { %762 = vmatpush3.msra.mxu0 %v29_v44  ;;  %820 = vmatpush3.msra.mxu1 %v212_v56  ;;  %v453_v33 = vld [vmem:[%s1258_s4 + $0x28] sm:$0xff]  ;;  %v452_v34 = vld [vmem:[%s1258_s4 + $0x20] sm:$0xff]  ;;  %v450_v36 = vld [vmem:[%s1258_s4 + $0x10] sm:$0xff] }
  0x18   :  { %763 = vmatprep.subr.mxu0 %v44_v46  ;;  %193 = vadd.xlane.f32.xlu1 %v192_v45  ;;  %v449_v37 = vld [vmem:[%s1258_s4 + $0x8] sm:$0xff]  ;;  %v448_v38 = vld [vmem:[%s1258_s4] sm:$0xff] }
  0x19   :  { %764 = vmatpush3.msra.mxu0 %v28_v47  ;;  %821 = vmatprep.subr.mxu1 %v211_v57  ;;  %v1211_v43 = vld [vmem:[%s1259_s5] sm:$0x7] }
  0x1a   :  { %765 = vmatprep.subr.mxu0 %v43_v48  ;;  %822 = vmatpush3.msra.mxu1 %v211_v57  ;;  %v419_v44 = vrot.slane %v1211_v43, %v68_v12 }
  0x1b   :  { %766 = vmatpush3.msra.mxu0 %v27_v49  ;;  %823 = vmatprep.mubr.msk.f32.mxu1 %vm220_vm8, %v56_v58 }
  0x1c   :  { %767 = vmatprep.subr.mxu0 %v42_v50  ;;  %824 = vmatmul.mubr.msk.f32.vlgmr.msra.gmra.mxu1 %vm220_vm8, %v57_v59 }
  0x1d   :  { %768 = vmatpush3.msra.mxu0 %v26_v51  ;;  %829 = vmatprep.subr.mxu1 %v210_v60 }
  0x1e   :  { %769 = vmatprep.subr.mxu0 %v41_v52  ;;  %830 = vmatpush3.msra.mxu1 %v210_v60 }
  0x1f   :  { %770 = vmatpush3.msra.mxu0 %v25_v53  ;;  %826 = vmatprep.mubr.msk.f32.mxu1 %vm220_vm8, %v58_v61 }
  0x20   :  { %771 = vmatprep.subr.mxu0 %v40_v54  ;;  %831 = vmatprep.subr.mxu1 %v209_v62 }
  0x21   :  { %772 = vmatpush3.msra.mxu0 %v24_v55  ;;  %827 = vmatmul.mubr.msk.f32.gmra.mxu1 %vm220_vm8, %v59_v63 }
  0x22   :  { %710 = vmatmul.mubr.msk.f32.vlgmr.msra.gmra.mxu0 %vm74_vm1, %v930_v27  ;;  %832 = vmatpush3.msra.mxu1 %v209_v62 }
  0x23   :  { %711 = vmatprep.mubr.msk.f32.mxu0 %vm77_vm2, %v930_v27  ;;  %833 = vmatprep.subr.mxu1 %v208_v0 }
  0x24   :  { %834 = vmatpush3.msra.mxu1 %v208_v0 }
  0x25   :  { %835 = vmatprep.subr.mxu1 %v207_v1 }
  0x26   :  { %712 = vmatmul.mubr.msk.f32.gmra.mxu0 %vm76_vm3, %v930_v27  ;;  %836 = vmatpush3.msra.mxu1 %v207_v1 }
  0x27   :  { %713 = vmatprep.mubr.msk.f32.mxu0 %vm79_vm4, %v930_v27  ;;  %843 = vmatprep.subr.mxu1 %v453_v33 }
  0x2a   :  { %714 = vmatmul.mubr.msk.f32.gmra.mxu0 %vm78_vm5, %v930_v27 }
  0x2b   :  { %715 = vmatprep.mubr.msk.f32.mxu0 %vm81_vm6, %v930_v27 }
  0x2e   :  { %716 = vmatmul.mubr.msk.f32.gmra.mxu0 %vm80_vm7, %v930_v27 }
  0x9b   :  { %v185_v2 = vpop.xlane.xlu0 %184 }
  0x9c   :  { %v195_v3 = vmax.f32 %v185_v2, 1.0 }
  0x9d   :  { %v191_v5 = vpop.xlane.xlu1 %190 }
  0x9e   :  { %884 = vrcp.f32 %v195_v3  ;;  %v197_v8 = vmax.f32 %v191_v5, 1.0 }
  0x9f   :  { %v188_v4 = vpop.xlane.xlu0 %187 }
  0xa0   :  { %v196_v6 = vmax.f32 %v188_v4, 1.0 }
  0xa1   :  { %v194_v9 = vpop.xlane.xlu1 %193 }
  0xa2   :  { %886 = vrcp.f32 %v196_v6  ;;  %v198_v10 = vmax.f32 %v194_v9, 1.0 }
  0xa3   :  { %888 = vrcp.f32 %v197_v8 }
  0xa4   :  { %890 = vrcp.f32 %v198_v10 }
  0xab   :  { %v885_v14 = vpop.eup %884 }
  0xaf   :  { %v887_v19 = vpop.eup %886 }
  0xb0   :  { %v889_v24 = vpop.eup %888 }
  0xb1   :  { %v891_v29 = vpop.eup %890 }
  0xdc   :  { %v825_v39 = vpop.f32.mrf.mxu1 }
  0xde   :  { %v299_v40 = vpop.f32.mrf.mxu1 }
  0xe1   :  { %v828_v41 = vpop.f32.mrf.mxu1 }
  0xe2   :  { %v773_v11 = vpop.f32.mrf.mxu0 }
  0xe3   :  { %v309_v42 = vpop.f32.mrf.mxu1 }
  0xe4   :  { %v774_v15 = vpop.f32.mrf.mxu0 }
  0xe5   :  { %v775_v16 = vadd.f32 %v774_v15, %v773_v11  ;;  %v218_v15 = vld [vmem:[%s1257_s3 + $0x58] sm:$0xff] }
  0xe6   :  { %v776_v17 = vpop.f32.mrf.mxu0 }
  0xe7   :  { %v200_v18 = vmul.f32 %v885_v14, %v775_v16  ;;  %v217_v16 = vld [vmem:[%s1257_s3 + $0x50] sm:$0xff] }
  0xe8   :  { %v777_v20 = vpop.f32.mrf.mxu0 }
  0xe9   :  { %v778_v21 = vadd.f32 %v777_v20, %v776_v17  ;;  %837 = vmatprep.mubr.msk.f32.mxu1 %vm318_vm9, %v200_v18  ;;  %v216_v17 = vld [vmem:[%s1257_s3 + $0x48] sm:$0xff]  ;;  %v215_v18 = vld [vmem:[%s1257_s3 + $0x40] sm:$0xff]  ;;  %v213_v20 = vld [vmem:[%s1257_s3 + $0x30] sm:$0xff] }
  0xea   :  { %v779_v22 = vpop.f32.mrf.mxu0 }
  0xeb   :  { %v202_v23 = vmul.f32 %v887_v19, %v778_v21  ;;  %v214_v19 = vld [vmem:[%s1257_s3 + $0x38] sm:$0xff]  ;;  %v457_v21 = vrot.slane %v1211_v43, %v72_v13  ;;  %s932_s3 = smov [#allocation2]  }
  0xec   :  { %v780_v25 = vpop.f32.mrf.mxu0  ;;  %s690_s28 = sshll.u32 %s932_s3, 4  ;;  %s691_s28 = int_to_ptr.vmem [resolvable:$true] %s690_s28 }
  0xed   :  { %v781_v26 = vadd.f32 %v780_v25, %v779_v22  ;;  %838 = vmatmul.mubr.msk.f32.vlgmr.msra.gmra.mxu1 %vm318_vm9, %v202_v23  ;;  %s908_s29 = scalar_lea.vmem %s691_s28, 512  ;;  %p913_p1 = scmp.lt.s32.totalorder %s691_s28, %s691_s28 }
  0xee   :  { %v782_v27 = vpop.f32.mrf.mxu0  ;;  %844 = vmatpush3.msra.mxu1 %v453_v33  ;;  %p909_p0 = scmp.ne.s32.totalorder %s691_s28, %s908_s29  ;;  %p914_p2 = scmp.lt.s32.totalorder %s908_s29, %s908_s29 }
  0xef   :  { %v204_v28 = vmul.f32 %v889_v24, %v781_v26  ;;  %845 = vmatprep.subr.mxu1 %v452_v34 }
  0xf0   :  { %v783_v30 = vpop.f32.mrf.mxu0  ;;  %846 = vmatpush3.msra.mxu1 %v452_v34  ;;  %p915_p3 = por %p914_p2, %p913_p1 }
  0xf1   :  { %v784_v31 = vadd.f32 %v783_v30, %v782_v27  ;;  %840 = vmatprep.mubr.msk.f32.mxu1 %vm318_vm9, %v204_v28  ;;  %847 = vmatprep.subr.mxu1 %v451_v35 }
  0xf2   :  { %848 = vmatpush3.msra.mxu1 %v451_v35  ;;  %p916_p4 = pnand %p915_p3, %p909_p0 }
  0xf3   :  { %v206_v32 = vmul.f32 %v891_v29, %v784_v31  ;;  %849 = vmatprep.subr.mxu1 %v450_v36 }
  0xf4   :  { %850 = vmatpush3.msra.mxu1 %v450_v36 }
  0xf5   :  { %841 = vmatmul.mubr.msk.f32.gmra.mxu1 %vm318_vm9, %v206_v32  ;;  %851 = vmatprep.subr.mxu1 %v449_v37 }
  0xf6   :  { %852 = vmatpush3.msra.mxu1 %v449_v37 }
  0xf7   :  { %853 = vmatprep.subr.mxu1 %v448_v38 }
  0xf8   :  { %854 = vmatpush3.msra.mxu1 %v448_v38 }
  0xf9   :  { %861 = vmatprep.subr.mxu1 %v218_v15 }
 0x1ad   :  { %v839_v45 = vpop.f32.mrf.mxu1 }
 0x1ae   :  { %v403_v46 = vadd.f32 %v839_v45, %v825_v39 }
 0x1af   :  { %v397_v47 = vpop.f32.mrf.mxu1 }
 0x1b0   :  { %v421_v48 = vadd.f32 %v419_v44, %v403_v46  ;;  %v398_v49 = vadd.f32 %v397_v47, %v299_v40 }
 0x1b2   :  { %v429_v50 = vmin.f32 %v421_v48, 0.0  ;;  %v420_v51 = vadd.f32 %v419_v44, %v398_v49  ;;  %vm425_vm12 = vcmp.gt.f32.partialorder %v421_v48, 0.0 }
 0x1b4   :  { %v434_v52 = vmul.f32 1.442695, %v429_v50  ;;  %v428_v53 = vmin.f32 %v420_v51, 0.0  ;;  %vm424_vm11 = vcmp.gt.f32.partialorder %v420_v51, 0.0  ;;  %v582_v50 = vsub.s32 2, %v988_v7 }
 0x1b5   :  { %v842_v54 = vpop.f32.mrf.mxu1 }
 0x1b6   :  { %892 = vpow2.f32 %v434_v52  ;;  %v432_v55 = vmul.f32 1.442695, %v428_v53  ;;  %v413_v56 = vadd.f32 %v842_v54, %v828_v41 }
 0x1b7   :  { %v407_v57 = vpop.f32.mrf.mxu1 }
 0x1b8   :  { %894 = vpow2.f32 %v432_v55  ;;  %v423_v58 = vadd.f32 %v419_v44, %v413_v56  ;;  %v408_v59 = vadd.f32 %v407_v57, %v309_v42 }
 0x1ba   :  { %v431_v60 = vmin.f32 %v423_v58, 0.0  ;;  %v422_v61 = vadd.f32 %v419_v44, %v408_v59  ;;  %vm427_vm14 = vcmp.gt.f32.partialorder %v423_v58, 0.0 }
 0x1bc   :  { %v438_v12 = vmul.f32 1.442695, %v431_v60  ;;  %v430_v62 = vmin.f32 %v422_v61, 0.0  ;;  %vm426_vm13 = vcmp.gt.f32.partialorder %v422_v61, 0.0 }
 0x1be   :  { %896 = vpow2.f32 %v438_v12  ;;  %v436_v63 = vmul.f32 1.442695, %v430_v62 }
 0x1c0   :  { %898 = vpow2.f32 %v436_v63 }
 0x1c3   :  { %v893_v0 = vpop.eup %892 }
 0x1c4   :  { %v726_v2 = vadd.f32 -1.0, %v893_v0 }
 0x1c5   :  { %v895_v1 = vpop.eup %894 }
 0x1c6   :  { %v725_v3 = vadd.f32 -1.0, %v895_v1  ;;  %v445_v5 = vsel %vm425_vm12, %v421_v48, %v726_v2 }
 0x1c8   :  { %v444_v4 = vsel %vm424_vm11, %v420_v51, %v725_v3  ;;  %v583_v51 = vrot.slane %v1211_v43, %v582_v50 }
 0x1c9   :  { %855 = vmatprep.mubr.msk.f32.mxu1 %vm458_vm10, %v444_v4 }
 0x1ca   :  { %856 = vmatmul.mubr.msk.f32.vlgmr.msra.gmra.mxu1 %vm458_vm10, %v445_v5 }
 0x1cb   :  { %v897_v6 = vpop.eup %896  ;;  %862 = vmatpush3.msra.mxu1 %v218_v15 }
 0x1cc   :  { %v728_v9 = vadd.f32 -1.0, %v897_v6  ;;  %863 = vmatprep.subr.mxu1 %v217_v16 }
 0x1cd   :  { %v899_v8 = vpop.eup %898  ;;  %864 = vmatpush3.msra.mxu1 %v217_v16 }
 0x1ce   :  { %v727_v10 = vadd.f32 -1.0, %v899_v8  ;;  %v447_v14 = vsel %vm427_vm14, %v423_v58, %v728_v9  ;;  %865 = vmatprep.subr.mxu1 %v216_v17 }
 0x1cf   :  { %866 = vmatpush3.msra.mxu1 %v216_v17 }
 0x1d0   :  { %v446_v11 = vsel %vm426_vm13, %v422_v61, %v727_v10  ;;  %867 = vmatprep.subr.mxu1 %v215_v18 }
 0x1d1   :  { %858 = vmatprep.mubr.msk.f32.mxu1 %vm458_vm10, %v446_v11  ;;  %868 = vmatpush3.msra.mxu1 %v215_v18 }
 0x1d2   :  { %859 = vmatmul.mubr.msk.f32.gmra.mxu1 %vm458_vm10, %v447_v14  ;;  %869 = vmatprep.subr.mxu1 %v214_v19 }
 0x1d3   :  { %870 = vmatpush3.msra.mxu1 %v214_v19 }
 0x1d4   :  { %871 = vmatprep.subr.mxu1 %v213_v20 }
 0x1d5   :  { %872 = vmatpush3.msra.mxu1 %v213_v20 }
 0x28a   :  { %v857_v22 = vpop.f32.mrf.mxu1 }
 0x28b   :  { %v543_v23 = vadd.f32 %v857_v22, %v457_v21 }
 0x28c   :  { %v537_v24 = vpop.f32.mrf.mxu1 }
 0x28d   :  { %v561_v25 = vmin.f32 %v543_v23, 0.0  ;;  %v538_v26 = vadd.f32 %v537_v24, %v457_v21  ;;  %vm557_vm0 = vcmp.gt.f32.partialorder %v543_v23, 0.0 }
 0x28f   :  { %v566_v27 = vmul.f32 1.442695, %v561_v25  ;;  %v560_v28 = vmin.f32 %v538_v26, 0.0  ;;  %vm556_vm15 = vcmp.gt.f32.partialorder %v538_v26, 0.0 }
 0x291   :  { %900 = vpow2.f32 %v566_v27  ;;  %v564_v29 = vmul.f32 1.442695, %v560_v28 }
 0x292   :  { %v860_v30 = vpop.f32.mrf.mxu1 }
 0x293   :  { %902 = vpow2.f32 %v564_v29  ;;  %v553_v31 = vadd.f32 %v860_v30, %v457_v21 }
 0x294   :  { %v547_v32 = vpop.f32.mrf.mxu1 }
 0x295   :  { %v563_v33 = vmin.f32 %v553_v31, 0.0  ;;  %v548_v34 = vadd.f32 %v547_v32, %v457_v21  ;;  %vm559_vm2 = vcmp.gt.f32.partialorder %v553_v31, 0.0 }
 0x297   :  { %v570_v35 = vmul.f32 1.442695, %v563_v33  ;;  %v562_v36 = vmin.f32 %v548_v34, 0.0  ;;  %vm558_vm1 = vcmp.gt.f32.partialorder %v548_v34, 0.0 }
 0x299   :  { %904 = vpow2.f32 %v570_v35  ;;  %v568_v37 = vmul.f32 1.442695, %v562_v36 }
 0x29b   :  { %906 = vpow2.f32 %v568_v37 }
 0x29e   :  { %v901_v13 = vpop.eup %900 }
 0x29f   :  { %v734_v39 = vadd.f32 -1.0, %v901_v13 }
 0x2a0   :  { %v903_v38 = vpop.eup %902 }
 0x2a1   :  { %v733_v40 = vadd.f32 -1.0, %v903_v38  ;;  %v577_v42 = vsel %vm557_vm0, %v543_v23, %v734_v39 }
 0x2a3   :  { %v576_v41 = vsel %vm556_vm15, %v538_v26, %v733_v40 }
 0x2a4   :  { %873 = vmatprep.mubr.msk.f32.mxu1 %vm458_vm10, %v576_v41 }
 0x2a5   :  { %874 = vmatmul.mubr.msk.f32.vlgmr.msra.gmra.mxu1 %vm458_vm10, %v577_v42 }
 0x2a6   :  { %v905_v44 = vpop.eup %904 }
 0x2a7   :  { %v736_v46 = vadd.f32 -1.0, %v905_v44 }
 0x2a8   :  { %v907_v45 = vpop.eup %906 }
 0x2a9   :  { %v735_v47 = vadd.f32 -1.0, %v907_v45  ;;  %v579_v49 = vsel %vm559_vm2, %v553_v31, %v736_v46 }
 0x2ab   :  { %v578_v48 = vsel %vm558_vm1, %v548_v34, %v735_v47 }
 0x2ac   :  { %876 = vmatprep.mubr.msk.f32.mxu1 %vm458_vm10, %v578_v48 }
 0x2ad   :  { %877 = vmatmul.mubr.msk.f32.gmra.mxu1 %vm458_vm10, %v579_v49 }
 0x365   :  { %v875_v52 = vpop.f32.mrf.mxu1 }
 0x366   :  { %v668_v53 = vadd.f32 %v875_v52, %v583_v51 }
 0x367   :  { %v662_v54 = vpop.f32.mrf.mxu1 }
 0x368   :  { %682 = vst.msk [vmem:[#allocation2 + $0x8] sm:$0xff] %vm458_vm10, %v668_v53  ;;  %v663_v55 = vadd.f32 %v662_v54, %v583_v51 }
 0x36a   :  { %681 = vst.msk [vmem:[#allocation2] sm:$0xff] %vm458_vm10, %v663_v55 }
 0x36d   :  { %v878_v56 = vpop.f32.mrf.mxu1 }
 0x36e   :  { %v678_v57 = vadd.f32 %v878_v56, %v583_v51 }
 0x36f   :  { %v672_v58 = vpop.f32.mrf.mxu1 }
 0x370   :  { %684 = vst.msk [vmem:[#allocation2 + $0x18] sm:$0xff] %vm458_vm10, %v678_v57  ;;  %v673_v59 = vadd.f32 %v672_v58, %v583_v51 }
 0x372   :  { %683 = vst.msk [vmem:[#allocation2 + $0x10] sm:$0xff] %vm458_vm10, %v673_v59 }
 0x373   :  { %919 = shalt.err (!%p916_p4)
}
 0x374   :  { %s933_s30 = smov 128   ;;  %s934_s2 = smov 8  }
 0x375   :  { %696 = dma.vmem_to_hbm [thread:$0]  %s691_s28, 512, %s1260_s6, [#allocation3], %s933_s30, %s933_s30, %s934_s2  }
 0x376   :  { %928 = dma.done.wait [#allocation3], 512  }
 0x377   :  { %929 = vsyncadd [#allocation3], 4294966784 }
 0x378   :  { %700 = vsyncpa [#allocation3], 1 }

</bundles_post_ra>
